<compile_context>
chip_gen: v6e
topology: v6e:2x2x1
jax: 0.10.0
libtpu: 0.0.40
codegen_flags: <defaults>
</compile_context>

<pallas_src>
import functools

import jax
import jax.numpy as jnp
from jax.experimental import pallas as pl
from jax.experimental.pallas import tpu as pltpu

# ----------------------------------------------------------------------------
# Tiling helpers
# ----------------------------------------------------------------------------
_MAX_TK = 2048     # largest single-step K tile (bf16 -> <=1 MiB per operand tile)
_BIG_TK = 1152     # 9*128: divides every large K (Cin*9 with Cin a multiple of 128)
_MAX_TM = 256


def _round_up(a, m):
    return ((a + m - 1) // m) * m


def _pad_k(k):
    kp = _round_up(k, 8)
    return kp if kp <= _MAX_TK else _round_up(k, _BIG_TK)


def _tiles_m(m):
    mp = _round_up(m, 8)
    if mp <= _MAX_TM:
        return mp, mp
    return _round_up(m, _MAX_TM), _MAX_TM


# ----------------------------------------------------------------------------
# Fused matmul kernel: out = act((x @ w) + b [+ residual / gated blend])
# ----------------------------------------------------------------------------
_KERNELS = {}


def _get_kernel(n_extra, epilogue):
    key = (n_extra, epilogue)
    if key in _KERNELS:
        return _KERNELS[key]

    def kernel(x_ref, w_ref, b_ref, *rest):
        extras = rest[:n_extra]
        o_ref = rest[n_extra]
        acc_ref = rest[n_extra + 1]
        k = pl.program_id(2)

        @pl.when(k == 0)
        def _():
            acc_ref[...] = jnp.zeros_like(acc_ref)

        acc_ref[...] += jnp.dot(x_ref[...], w_ref[...],
                                preferred_element_type=jnp.float32)

        @pl.when(k == pl.num_programs(2) - 1)
        def _():
            y = acc_ref[...] + b_ref[...]
            if epilogue == "relu":
                y = jnp.maximum(y, 0.0)
            elif epilogue == "sigmoid":
                y = jax.nn.sigmoid(y)
            elif epilogue == "add_relu":
                y = jnp.maximum(y + extras[0][...].astype(jnp.float32), 0.0)
            elif epilogue == "gff":
                g = jax.nn.sigmoid(y)
                y = (g * extras[0][...].astype(jnp.float32)
                     + (1.0 - g) * extras[1][...].astype(jnp.float32))
            o_ref[...] = y.astype(o_ref.dtype)

    _KERNELS[key] = kernel
    return kernel


@functools.partial(jax.jit, static_argnames=("epilogue",))
def _matmul_fused(x, w, b, *extras, epilogue):
    """act((x @ w) + b) with an optional fused residual / gated-blend epilogue.

    x: (M, K) float; w: (Kp, Np) bf16 (pre-padded, BN scale folded); b: (1, N) f32.
    extras: zero or more (M, N) tensors consumed by the epilogue.  Returns (M, N) bf16.
    """
    M, K = x.shape
    Kp, Np = w.shape
    N = b.shape[1]
    Mp, TM = _tiles_m(M)
    TK = Kp if Kp <= _MAX_TK else _BIG_TK
    TN = 256 if Np % 256 == 0 else 128

    xp = jnp.pad(x.astype(jnp.bfloat16), ((0, Mp - M), (0, Kp - K)))
    bp = jnp.pad(b, ((0, 0), (0, Np - N)))
    eps = tuple(jnp.pad(e, ((0, Mp - M), (0, Np - N))) for e in extras)

    n_extra = len(extras)
    kern = _get_kernel(n_extra, epilogue)

    in_specs = ([pl.BlockSpec((TM, TK), lambda i, j, k: (i, k)),
                 pl.BlockSpec((TK, TN), lambda i, j, k: (k, j)),
                 pl.BlockSpec((1, TN), lambda i, j, k: (0, j))]
                + [pl.BlockSpec((TM, TN), lambda i, j, k: (i, j))
                   for _ in range(n_extra)])

    flops = 2 * Mp * Kp * Np
    transcendentals = Mp * Np if epilogue in ("sigmoid", "gff") else 0
    bytes_accessed = (Mp * Kp * 2 + Kp * Np * 2 + Np * 4
                      + Mp * Np * 2 * (1 + n_extra))

    out = pl.pallas_call(
        kern,
        out_shape=jax.ShapeDtypeStruct((Mp, Np), jnp.bfloat16),
        grid_spec=pltpu.PrefetchScalarGridSpec(
            num_scalar_prefetch=0,
            grid=(Mp // TM, Np // TN, Kp // TK),
            in_specs=in_specs,
            out_specs=pl.BlockSpec((TM, TN), lambda i, j, k: (i, j)),
            scratch_shapes=[pltpu.VMEM((TM, TN), jnp.float32)],
        ),
        compiler_params=pltpu.CompilerParams(
            dimension_semantics=("parallel", "parallel", "arbitrary")),
        cost_estimate=pl.CostEstimate(flops=flops,
                                      transcendentals=transcendentals,
                                      bytes_accessed=bytes_accessed),
    )(xp, w, bp, *eps)
    return out[:M, :N]


# ----------------------------------------------------------------------------
# Lane-dense elementwise Pallas kernels (mask cut / final blend)
# ----------------------------------------------------------------------------
_EW_LANES = 512


def _cut_kernel(ori_ref, m_ref, o_ref):
    o_ref[...] = ori_ref[...] * (m_ref[...] < 0.5).astype(o_ref.dtype)


def _blend_kernel(inp_ref, ori_ref, m_ref, o_ref):
    # Matches the reference exactly: mask == 0.5 contributes to neither term.
    m = m_ref[...]
    o_ref[...] = (inp_ref[...] * (m > 0.5).astype(o_ref.dtype)
                  + ori_ref[...] * (m < 0.5).astype(o_ref.dtype))


@functools.partial(jax.jit, static_argnames=("kernel",))
def _ew_call(*arrays, kernel):
    """Flatten to lane-dense (rows, 512) f32 tiles and run a small Pallas kernel."""
    shape = arrays[0].shape
    n = arrays[0].size
    rows = _round_up(pl.cdiv(n, _EW_LANES), 8)
    total = rows * _EW_LANES
    flats = [jnp.pad(a.astype(jnp.float32).reshape(-1),
                     (0, total - n)).reshape(rows, _EW_LANES) for a in arrays]
    out = pl.pallas_call(
        kernel,
        out_shape=jax.ShapeDtypeStruct((rows, _EW_LANES), jnp.float32))(*flats)
    return out.reshape(-1)[:n].reshape(shape)


# ----------------------------------------------------------------------------
# Convolutions built on the fused Pallas matmul
# ----------------------------------------------------------------------------
def _im2col_nhwc(x, kh, kw, stride, padding):
    B, H, W, C = x.shape
    if padding:
        x = jnp.pad(x, ((0, 0), (padding, padding), (padding, padding), (0, 0)))
    Ho = (H + 2 * padding - kh) // stride + 1
    Wo = (W + 2 * padding - kw) // stride + 1
    cols = []
    for ky in range(kh):
        for kx in range(kw):
            cols.append(x[:, ky:ky + (Ho - 1) * stride + 1:stride,
                            kx:kx + (Wo - 1) * stride + 1:stride, :])
    return jnp.concatenate(cols, axis=-1), Ho, Wo


def conv2d_nhwc(x, prep, stride=1, padding=0, epilogue="relu", extras=()):
    """Fused conv + folded-BN + activation on an NHWC input."""
    B, H, W, C = x.shape
    kh, kw = prep["kh"], prep["kw"]
    xb = x.astype(jnp.bfloat16)
    if kh == 1 and kw == 1 and padding == 0:
        xs = xb[:, ::stride, ::stride, :] if stride > 1 else xb
        Ho, Wo = xs.shape[1], xs.shape[2]
        cols = xs.reshape(B * Ho * Wo, C)
    else:
        cols, Ho, Wo = _im2col_nhwc(xb, kh, kw, stride, padding)
        cols = cols.reshape(B * Ho * Wo, kh * kw * C)
    out = _matmul_fused(cols, prep["w"], prep["b"], *extras, epilogue=epilogue)
    N = prep["b"].shape[1]
    return out.reshape(B, Ho, Wo, N)


def conv_transpose_up(x, prep):
    """ConvTranspose2d(k=3,s=2,p=1,op=1) + BN + ReLU via sub-pixel decomposition."""
    B, H, W, C = x.shape
    xb = jnp.pad(x.astype(jnp.bfloat16), ((0, 0), (0, 1), (0, 1), (0, 0)))
    taps = [xb[:, ty:ty + H, tx:tx + W, :] for ty in range(2) for tx in range(2)]
    cols = jnp.concatenate(taps, axis=-1).reshape(B * H * W, 4 * C)
    out = _matmul_fused(cols, prep["w"], prep["b"], epilogue="relu")
    Cout = prep["b"].shape[1] // 4
    out = out.reshape(B, H, W, 2, 2, Cout).transpose(0, 1, 3, 2, 4, 5)
    return out.reshape(B, 2 * H, 2 * W, Cout)


def maxpool3x3s2(x):
    return jax.lax.reduce_window(
        x, jnp.array(-jnp.inf, x.dtype), jax.lax.max,
        window_dimensions=(1, 3, 3, 1), window_strides=(1, 2, 2, 1),
        padding=((0, 0), (1, 1), (1, 1), (0, 0)))


def upsample_bilinear2x(x):
    # nn.Upsample(scale_factor=2, mode='bilinear', align_corners=False)
    B, H, W, C = x.shape
    return jax.image.resize(x, (B, 2 * H, 2 * W, C), method="bilinear")


def cat2(x1, x2):
    dY = x2.shape[1] - x1.shape[1]
    dX = x2.shape[2] - x1.shape[2]
    if dY or dX:
        x1 = jnp.pad(x1, ((0, 0), (dY // 2, dY - dY // 2),
                          (dX // 2, dX - dX // 2), (0, 0)))
    return jnp.concatenate([x1, x2], axis=-1)


# ----------------------------------------------------------------------------
# Deterministic parameter construction (weights prepared once: BN fold, bf16, pad)
# ----------------------------------------------------------------------------
class PGen:
    def __init__(self, seed=42):
        self.key = jax.random.PRNGKey(seed)
        self.i = 0

    def next(self):
        self.i += 1
        return jax.random.fold_in(self.key, self.i)

    def conv(self, cout, cin, kh, kw, bias=True):
        fan_in = cin * kh * kw
        w = jax.random.normal(self.next(), (cout, cin, kh, kw),
                              jnp.float32) * jnp.sqrt(2.0 / fan_in)
        b = (jax.random.normal(self.next(), (cout,), jnp.float32) * 0.01
             if bias else jnp.zeros((cout,), jnp.float32))
        return {"w": w, "b": b}

    def bn(self, c):
        # eval-mode BatchNorm with gamma=1, beta=0, running_mean=0, running_var=1
        eps = 1e-5
        return {"scale": jnp.full((c,), 1.0 / jnp.sqrt(1.0 + eps), jnp.float32),
                "bias": jnp.zeros((c,), jnp.float32)}


def prep_conv(w, conv_bias, bn):
    """Fold eval-mode BN into the conv, reshape to (K, Cout), bf16-cast, tile-pad."""
    cout, cin, kh, kw = w.shape
    if bn is not None:
        s, b0 = bn["scale"], bn["bias"]
    else:
        s = jnp.ones((cout,), jnp.float32)
        b0 = jnp.zeros((cout,), jnp.float32)
    bias = b0 + conv_bias * s
    w2 = (w * s[:, None, None, None]).transpose(2, 3, 1, 0).reshape(kh * kw * cin, cout)
    K, N = w2.shape
    Kp, Np = _pad_k(K), _round_up(N, 128)
    return {"w": jnp.pad(w2, ((0, Kp - K), (0, Np - N))).astype(jnp.bfloat16),
            "b": bias.reshape(1, N).astype(jnp.float32),
            "kh": kh, "kw": kw}


def prep_deconv(w, bn):
    """Sub-pixel weight for ConvTranspose2d(k=3,s=2,p=1,op=1); w: (Cin, Cout, 3, 3)."""
    cin, cout = w.shape[0], w.shape[1]
    ws = w * bn["scale"][None, :, None, None]
    rows = []
    for ty in range(2):
        for tx in range(2):
            cols = []
            for dy in range(2):
                for dx in range(2):
                    ky, kx = dy + 1 - 2 * ty, dx + 1 - 2 * tx
                    if 0 <= ky <= 2 and 0 <= kx <= 2:
                        cols.append(ws[:, :, ky, kx])
                    else:
                        cols.append(jnp.zeros((cin, cout), jnp.float32))
            rows.append(jnp.concatenate(cols, axis=1))
    wbig = jnp.concatenate(rows, axis=0)                # (4*Cin, 4*Cout)
    bias = jnp.tile(bn["bias"], 4)
    K, N = wbig.shape
    Kp, Np = _pad_k(K), _round_up(N, 128)
    return {"w": jnp.pad(wbig, ((0, Kp - K), (0, Np - N))).astype(jnp.bfloat16),
            "b": bias.reshape(1, N).astype(jnp.float32)}


def make_convblock(pg, cin, cout, k):
    c = pg.conv(cout, cin, k, k, bias=True)
    return prep_conv(c["w"], c["b"], pg.bn(cout))


def make_plain_conv(pg, cout, cin, k):
    c = pg.conv(cout, cin, k, k, bias=True)
    return prep_conv(c["w"], c["b"], None)


def make_encoder(pg, in_channels):
    c1 = pg.conv(64, in_channels, 7, 7, bias=False)
    p = {"conv1": prep_conv(c1["w"], c1["b"], pg.bn(64))}

    def make_layer(cin, cout, nblocks, stride):
        blocks = []
        for i in range(nblocks):
            s = stride if i == 0 else 1
            icin = cin if i == 0 else cout
            ds = None
            if s != 1 or icin != cout:
                d = pg.conv(cout, icin, 1, 1, bias=False)
                ds = prep_conv(d["w"], d["b"], pg.bn(cout))
            a = pg.conv(cout, icin, 3, 3, bias=False)
            b = pg.conv(cout, cout, 3, 3, bias=False)
            blocks.append({"conv1": prep_conv(a["w"], a["b"], pg.bn(cout)),
                           "conv2": prep_conv(b["w"], b["b"], pg.bn(cout)),
                           "downsample": ds, "stride": s})
        return blocks

    p["layer1"] = make_layer(64, 64, 3, 1)     # ResNet34 topology
    p["layer2"] = make_layer(64, 128, 4, 2)
    p["layer3"] = make_layer(128, 256, 6, 2)
    p["layer4"] = make_layer(256, 512, 3, 2)
    return p


def encoder_apply(p, x):
    e1 = conv2d_nhwc(x, p["conv1"], stride=2, padding=3, epilogue="relu")
    x1 = maxpool3x3s2(e1)

    def layer(blocks, h):
        for blk in blocks:
            s = blk["stride"]
            identity = h
            if blk["downsample"] is not None:
                identity = conv2d_nhwc(h, blk["downsample"], s, 0, "linear")
            out = conv2d_nhwc(h, blk["conv1"], s, 1, "relu")
            C = identity.shape[-1]
            # residual add + ReLU fused into conv2's matmul epilogue
            h = conv2d_nhwc(out, blk["conv2"], 1, 1, "add_relu",
                            extras=(identity.reshape(-1, C),))
        return h

    e2 = layer(p["layer1"], x1)
    e3 = layer(p["layer2"], e2)
    e4 = layer(p["layer3"], e3)
    e5 = layer(p["layer4"], e4)
    return e1, e2, e3, e4, e5


def make_decoder(pg, cin, cout, transpose=False):
    mid = cin // 4
    p = {"conv1": make_convblock(pg, cin, mid, 3),
         "conv2": make_convblock(pg, mid, cout, 3),
         "transpose": transpose}
    if transpose:
        # TODO(synk): reference DecoderBlock(transpose=True) declares
        # ConvTranspose2d(in//4, in//4) but feeds it conv2's out_channels output
        # (a shape bug in the PyTorch source); using cout->cout so the graph runs.
        w = jax.random.normal(pg.next(), (cout, cout, 3, 3),
                              jnp.float32) * jnp.sqrt(2.0 / (cout * 9))
        p["up"] = prep_deconv(w, pg.bn(cout))
    return p


def decoder_apply(p, x):
    x = conv2d_nhwc(x, p["conv1"], 1, 1, "relu")
    x = conv2d_nhwc(x, p["conv2"], 1, 1, "relu")
    if p["transpose"]:
        return conv_transpose_up(x, p["up"])
    return upsample_bilinear2x(x)


def make_sideout(pg, cin, cout):
    return {"conv1": make_convblock(pg, cin, cin // 4, 3),
            "conv2": make_plain_conv(pg, cout, cin // 4, 1)}


def sideout_apply(p, x, sigmoid):
    x = conv2d_nhwc(x, p["conv1"], 1, 1, "relu")
    # Dropout2d(0.1): identity at inference
    return conv2d_nhwc(x, p["conv2"], 1, 0, "sigmoid" if sigmoid else "linear")


def make_gff(pg, c):
    # TODO(synk): GFF is not defined in the reference source; standard gated feature
    # fusion is used: g = sigmoid(conv1x1(x1) + conv1x1(x2)); out = g*x1 + (1-g)*x2,
    # fused into a single Pallas matmul (K-concat of the two 1x1 convs + gff epilogue).
    g1 = pg.conv(c, c, 1, 1, bias=True)
    g2 = pg.conv(c, c, 1, 1, bias=True)
    w = jnp.concatenate([g1["w"][:, :, 0, 0].T, g2["w"][:, :, 0, 0].T], axis=0)
    bias = g1["b"] + g2["b"]
    K, N = w.shape
    Kp, Np = _pad_k(K), _round_up(N, 128)
    return {"w": jnp.pad(w, ((0, Kp - K), (0, Np - N))).astype(jnp.bfloat16),
            "b": bias.reshape(1, N).astype(jnp.float32)}


def gff_apply(p, x1, x2):
    B, H, W, C = x1.shape
    M = B * H * W
    xin = jnp.concatenate([x1, x2], axis=-1).reshape(M, 2 * C)
    out = _matmul_fused(xin, p["w"], p["b"],
                        x1.reshape(M, C), x2.reshape(M, C), epilogue="gff")
    return out.reshape(B, H, W, C)


def make_headconv(pg, cout):
    return {"cb": make_convblock(pg, 64, 32, 3),
            "final": make_plain_conv(pg, cout, 32, 1)}


def headconv_apply(p, x, sigmoid):
    x = conv2d_nhwc(x, p["cb"], 1, 1, "relu")
    # segconv's Dropout2d(0.1): identity at inference
    return conv2d_nhwc(x, p["final"], 1, 0, "sigmoid" if sigmoid else "linear")


def make_model_params(pg, num_classes=1, in_channels=3):
    P = {"encoder": make_encoder(pg, in_channels)}
    P["segDecoder5"] = make_decoder(pg, 512, 512)
    P["segDecoder4"] = make_decoder(pg, 512 + 256, 256)
    P["segDecoder3"] = make_decoder(pg, 256 + 128, 128)
    P["segDecoder2"] = make_decoder(pg, 128 + 64, 64)
    P["segDecoder1"] = make_decoder(pg, 64 + 64, 64)
    P["segSideout5"] = make_sideout(pg, 512, 1)
    P["segSideout4"] = make_sideout(pg, 256, 1)
    P["segSideout3"] = make_sideout(pg, 128, 1)
    P["segSideout2"] = make_sideout(pg, 64, 1)
    P["segconv"] = make_headconv(pg, num_classes)
    P["inpDecoder5"] = make_decoder(pg, 512, 512, transpose=True)
    P["inpDecoder4"] = make_decoder(pg, 512 + 256, 256, transpose=True)
    P["inpDecoder3"] = make_decoder(pg, 256 + 128, 128, transpose=True)
    P["inpDecoder2"] = make_decoder(pg, 128 + 64, 64, transpose=True)
    P["inpDecoder1"] = make_decoder(pg, 64 + 64, 64, transpose=True)
    P["inpSideout5"] = make_sideout(pg, 512, 3)
    P["inpSideout4"] = make_sideout(pg, 256, 3)
    P["inpSideout3"] = make_sideout(pg, 128, 3)
    P["inpSideout2"] = make_sideout(pg, 64, 3)
    P["gate1"] = make_gff(pg, 64)
    P["gate2"] = make_gff(pg, 64)
    P["gate3"] = make_gff(pg, 128)
    P["gate4"] = make_gff(pg, 256)
    P["gate5"] = make_gff(pg, 512)
    P["inpconv"] = make_headconv(pg, in_channels)
    return P


# ----------------------------------------------------------------------------
# Full forward pass (mirrors MyModel.forward; inputs/outputs NCHW like PyTorch)
# ----------------------------------------------------------------------------
def _to_nchw_f32(x):
    return jnp.transpose(x, (0, 3, 1, 2)).astype(jnp.float32)


def forward(P, x_nchw):
    x = jnp.transpose(x_nchw, (0, 2, 3, 1))          # NHWC internally
    ori = x

    # --- Seg branch, pass 1 ---
    e1, e2, e3, e4, e5 = encoder_apply(P["encoder"], x)
    d5 = decoder_apply(P["segDecoder5"], e5)
    d4 = decoder_apply(P["segDecoder4"], cat2(d5, e4))
    d3 = decoder_apply(P["segDecoder3"], cat2(d4, e3))
    d2 = decoder_apply(P["segDecoder2"], cat2(d3, e2))
    d1 = decoder_apply(P["segDecoder1"], cat2(d2, e1))
    mask1 = headconv_apply(P["segconv"], d1, sigmoid=True)

    # cut_ori = ori * (mask < 0.5)
    cut_ori = _ew_call(ori, jnp.broadcast_to(mask1, ori.shape), kernel=_cut_kernel)

    inpe1, inpe2, inpe3, inpe4, inpe5 = encoder_apply(P["encoder"], cut_ori)
    # The reference recomputes encoder(x) here; in eval mode it is bit-identical to
    # pass 1 (same weights, same input, pure function), so pass-1 features are reused.
    ge1 = gff_apply(P["gate1"], e1, inpe1)
    ge2 = gff_apply(P["gate2"], e2, inpe2)
    ge3 = gff_apply(P["gate3"], e3, inpe3)
    ge4 = gff_apply(P["gate4"], e4, inpe4)
    ge5 = gff_apply(P["gate5"], e5, inpe5)

    # --- Seg branch, pass 2 (gated features) + sideouts ---
    d5 = decoder_apply(P["segDecoder5"], ge5)
    sidemask5 = sideout_apply(P["segSideout5"], d5, sigmoid=True)
    d4 = decoder_apply(P["segDecoder4"], cat2(d5, ge4))
    sidemask4 = sideout_apply(P["segSideout4"], d4, sigmoid=True)
    d3 = decoder_apply(P["segDecoder3"], cat2(d4, ge3))
    sidemask3 = sideout_apply(P["segSideout3"], d3, sigmoid=True)
    d2 = decoder_apply(P["segDecoder2"], cat2(d3, ge2))
    sidemask2 = sideout_apply(P["segSideout2"], d2, sigmoid=True)
    d1 = decoder_apply(P["segDecoder1"], cat2(d2, ge1))
    mask = headconv_apply(P["segconv"], d1, sigmoid=True)

    # --- Inpainting branch ---
    inpd5 = decoder_apply(P["inpDecoder5"], ge5)
    inpimg5 = sideout_apply(P["inpSideout5"], inpd5, sigmoid=False)
    inpd4 = decoder_apply(P["inpDecoder4"], cat2(inpd5, ge4))
    inpimg4 = sideout_apply(P["inpSideout4"], inpd4, sigmoid=False)
    inpd3 = decoder_apply(P["inpDecoder3"], cat2(inpd4, ge3))
    inpimg3 = sideout_apply(P["inpSideout3"], inpd3, sigmoid=False)
    inpd2 = decoder_apply(P["inpDecoder2"], cat2(inpd3, ge2))
    inpimg2 = sideout_apply(P["inpSideout2"], inpd2, sigmoid=False)
    inpd1 = decoder_apply(P["inpDecoder1"], cat2(inpd2, ge1))
    inpimg = headconv_apply(P["inpconv"], inpd1, sigmoid=False)

    # inpimg = inpimg*(mask > 0.5) + ori*(mask < 0.5)
    inpimg = _ew_call(inpimg, ori, jnp.broadcast_to(mask, inpimg.shape),
                      kernel=_blend_kernel)

    return tuple(_to_nchw_f32(t) for t in
                 (mask, sidemask2, sidemask3, sidemask4, sidemask5,
                  inpimg, inpimg2, inpimg3, inpimg4, inpimg5))


if __name__ == "__main__":
    key = jax.random.PRNGKey(0)
    x = jax.random.normal(key, (1, 3, 64, 64), jnp.float32)  # NCHW, like PyTorch
    pg = PGen(42)
    params = make_model_params(pg, num_classes=1, in_channels=3)
    outs = forward(params, x)
    outs = jax.block_until_ready(outs)
    assert outs[0].shape == (1, 1, 64, 64) and outs[5].shape == (1, 3, 64, 64)
    print("KERNEL_OK")
</pallas_src>

<mosaic_0001>
module attributes {stable_mosaic.version = 11 : i64} {
  func.func @kernel(%arg0: i32, %arg1: i32, %arg2: i32, %arg3: memref<256x152xbf16, #tpu.memory_space<vmem>>, %arg4: memref<152x128xbf16, #tpu.memory_space<vmem>>, %arg5: memref<1x128xf32, #tpu.memory_space<vmem>>, %arg6: memref<256x128xbf16, #tpu.memory_space<vmem>>, %arg7: memref<256x128xf32, #tpu.memory_space<vmem>>) attributes {dimension_semantics = [#tpu.dimension_semantics<parallel>, #tpu.dimension_semantics<parallel>, #tpu.dimension_semantics<arbitrary>], iteration_bounds = array<i64: 4, 1, 1>, scalar_prefetch = 0 : i64, scratch_operands = 1 : i64, tpu.core_type = #tpu.core_type<tc>, window_params = [{transform_indices = @transform_0, window_bounds = array<i64: 256, 152>}, {transform_indices = @transform_1, window_bounds = array<i64: 152, 128>}, {transform_indices = @transform_2, window_bounds = array<i64: 1, 128>}, {transform_indices = @transform_3, window_bounds = array<i64: 256, 128>}]} {
    %c0_i32 = arith.constant 0 : i32
    %0 = arith.cmpi eq, %arg2, %c0_i32 : i32
    %1 = arith.extui %0 : i1 to i32
    %c0_i32_0 = arith.constant 0 : i32
    %2 = arith.cmpi ne, %1, %c0_i32_0 : i32
    scf.if %2 {
      %cst_10 = arith.constant 0.000000e+00 : f32
      %12 = vector.broadcast %cst_10 : f32 to vector<256x128xf32>
      %c0_11 = arith.constant 0 : index
      %c0_12 = arith.constant 0 : index
      %13 = vector.load %arg7[%c0_11, %c0_12] : memref<256x128xf32, #tpu.memory_space<vmem>>, vector<256x128xf32>
      tpu.vector_store %arg7[%c0_11, %c0_12], %12 {strides = array<i32>} : memref<256x128xf32, #tpu.memory_space<vmem>>, vector<256x128xf32>,
    } else {
    }
    %c0 = arith.constant 0 : index
    %c0_1 = arith.constant 0 : index
    %3 = vector.load %arg7[%c0, %c0_1] : memref<256x128xf32, #tpu.memory_space<vmem>>, vector<256x128xf32>
    %c0_2 = arith.constant 0 : index
    %c0_3 = arith.constant 0 : index
    %4 = vector.load %arg3[%c0_2, %c0_3] : memref<256x152xbf16, #tpu.memory_space<vmem>>, vector<256x152xbf16>
    %c0_4 = arith.constant 0 : index
    %c0_5 = arith.constant 0 : index
    %5 = vector.load %arg4[%c0_4, %c0_5] : memref<152x128xbf16, #tpu.memory_space<vmem>>, vector<152x128xbf16>
    %cst = arith.constant dense<0.000000e+00> : vector<256x128xf32>
    %6 = tpu.matmul %4, %5, %cst {dimension_numbers = #tpu.dot_dimension_numbers<[1], [0], [0], [1], [0, 0, 1, 1], [], []>} : vector<256x152xbf16>, vector<152x128xbf16>, vector<256x128xf32> -> vector<256x128xf32>
    %7 = arith.addf %3, %6 : vector<256x128xf32>
    %c0_6 = arith.constant 0 : index
    %c0_7 = arith.constant 0 : index
    %8 = vector.load %arg7[%c0_6, %c0_7] : memref<256x128xf32, #tpu.memory_space<vmem>>, vector<256x128xf32>
    tpu.vector_store %arg7[%c0_6, %c0_7], %7 {strides = array<i32>} : memref<256x128xf32, #tpu.memory_space<vmem>>, vector<256x128xf32>,
    %c0_i32_8 = arith.constant 0 : i32
    %9 = arith.cmpi eq, %arg2, %c0_i32_8 : i32
    %10 = arith.extui %9 : i1 to i32
    %c0_i32_9 = arith.constant 0 : i32
    %11 = arith.cmpi ne, %10, %c0_i32_9 : i32
    scf.if %11 {
      %c0_10 = arith.constant 0 : index
      %c0_11 = arith.constant 0 : index
      %12 = vector.load %arg7[%c0_10, %c0_11] : memref<256x128xf32, #tpu.memory_space<vmem>>, vector<256x128xf32>
      %c0_12 = arith.constant 0 : index
      %c0_13 = arith.constant 0 : index
      %13 = vector.load %arg5[%c0_12, %c0_13] : memref<1x128xf32, #tpu.memory_space<vmem>>, vector<1x128xf32>
      %14 = vector.broadcast %13 : vector<1x128xf32> to vector<256x128xf32>
      %15 = arith.addf %12, %14 : vector<256x128xf32>
      %cst_14 = arith.constant 0.000000e+00 : f32
      %16 = vector.broadcast %cst_14 : f32 to vector<256x128xf32>
      %17 = arith.maximumf %15, %16 : vector<256x128xf32>
      %18 = arith.truncf %17 : vector<256x128xf32> to vector<256x128xbf16>
      %c0_15 = arith.constant 0 : index
      %c0_16 = arith.constant 0 : index
      %19 = vector.load %arg6[%c0_15, %c0_16] : memref<256x128xbf16, #tpu.memory_space<vmem>>, vector<256x128xbf16>
      tpu.vector_store %arg6[%c0_15, %c0_16], %18 {strides = array<i32>} : memref<256x128xbf16, #tpu.memory_space<vmem>>, vector<256x128xbf16>,
    } else {
    }
    return
  }
  func.func @transform_0(%arg0: i32, %arg1: i32, %arg2: i32) -> (i32, i32) {
    %c0_i32 = arith.constant 0 : i32
    return %arg0, %arg2 : i32, i32
  }
  func.func @transform_1(%arg0: i32, %arg1: i32, %arg2: i32) -> (i32, i32) {
    %c0_i32 = arith.constant 0 : i32
    return %arg2, %arg1 : i32, i32
  }
  func.func @transform_2(%arg0: i32, %arg1: i32, %arg2: i32) -> (i32, i32) {
    %c0_i32 = arith.constant 0 : i32
    %c0_i32_0 = arith.constant 0 : i32
    return %c0_i32, %arg1 : i32, i32
  }
  func.func @transform_3(%arg0: i32, %arg1: i32, %arg2: i32) -> (i32, i32) {
    %c0_i32 = arith.constant 0 : i32
    return %arg0, %arg1 : i32, i32
  }
}

</mosaic_0001>

<bundles_post_ra>
// kernel: _matmul_fused.1
= control target key start
LH: loop header
LB: loop body
LE: loop exit
PB: predicated region body
PF: predicated region fallthrough
CT: control target
= control target key end

     0   :  { %s1627_s12 = smov 0   ;;  %s1629_s13 = smov 0   ;;  %s1799_s0 = inlined_call_operand.vmem [shape: bf16[1024,152], index: 0, kind: input, shape index: {}]   ;;  %s1800_s1 = inlined_call_operand.vmem [shape: bf16[152,128], index: 1, kind: input, shape index: {}]   ;;  %s1801_s2 = inlined_call_operand.vmem [shape: f32[1,128], index: 2, kind: input, shape index: {}]   ;;  %s1802_s3 = inlined_call_operand.vmem [shape: bf16[1024,128], index: 3, kind: output, shape index: {}]  }
   0x1   :  { %s1631_s14 = smov 0  }
   0x2 LB: > { %s32_s15 = sadd.s32 1, %s1600_s13  ;;  %p1252_p0 = scmp.ge.s32.totalorder %s1604_s14, 1  ;;  %s1604_s14 = sphi %s1631_s14, %s13_s14   ;;  %s1600_s13 = sphi %s1629_s13, %s1804_s13   ;;  %s1596_s12 = sphi %s1627_s12, %s1803_s12  }
   0x3   : > { %p34_p1 = scmp.ge.s32.totalorder %s32_s15, 4  ;;  %p191_p2 = scmp.lt.s32.totalorder %s1604_s14, 5 }
   0x5   : > { %s1806_s15 = smov (%p34_p1, %s32_s15), 0  ;;  %p192_p3 = pnand %p1252_p0, %p191_p2 }
   0x6   : > { %s1253_s20 = sshll.u32 (!%p192_p3), %s1596_s12, 5 }
   0x7   : > { %195 = sbr.rel (%p192_p3) target bundleno = 313 (0x139), region = 32  ;;  %p236_p4 = scmp.lt.s32.totalorder (!%p192_p3), %s1253_s20, 127 }
   0xc   : > { %v1524_v0 = vld [vmem:[%s1800_s1 + $0x38] sm:$0xff]   ;;  %v1606_v1 = vmov 0   ;;  %v1525_v2 = vld [vmem:[%s1800_s1 + $0x30] sm:$0xff]   ;;  %s1808_s20 = smov (!%p236_p4, %s1253_s20), 127  ;;  %v1526_v3 = vld [vmem:[%s1800_s1 + $0x28] sm:$0xff]   ;;  %vm588_vm0 = vcmask 195584  }
   0xd   : > { %641 = vmatprep.subr.bf16.mxu0 %v1606_v1  ;;  %1479 = vmatprep.subr.bf16.mxu1 %v1606_v1  ;;  %s1351_s23 = sshll.u32 %s1808_s20, 3  ;;  %v1527_v4 = vld [vmem:[%s1800_s1 + $0x20] sm:$0xff]   ;;  %v1528_v7 = vld [vmem:[%s1800_s1 + $0x18] sm:$0xff]   ;;  %v1529_v8 = vld [vmem:[%s1800_s1 + $0x10] sm:$0xff]   ;;  %vm637_vm1 = vcmask 1043456   ;;  %s1257_s19 = sshll.u32 %s1808_s20, 2 }
   0xe   : > { %642 = vmatpush1.bf16.msra.mxu0 %v1524_v0  ;;  %1489 = vmatpush1.bf16.msra.mxu1 %v1524_v0  ;;  %s1660_s26 = scalar_lea.vmem %s1799_s0, %s1351_s23  ;;  %v1530_v9 = vld [vmem:[%s1800_s1 + $0x8] sm:$0xff]   ;;  %v1531_v10 = vld [vmem:[%s1800_s1] sm:$0xff]   ;;  %s1744_s23 = scalar_lea.vmem %s1802_s3, %s1257_s19 }
   0xf   : > { %643 = vmatprep.subr.bf16.mxu0 %v1606_v1  ;;  %1480 = vmatprep.subr.bf16.mxu1 %v1606_v1  ;;  %v1536_v5 = vld [vmem:[%s1660_s26 + $0x4] ss:$8 sps:$4 sm:$0xff]   ;;  %v1532_v11 = vld [vmem:[%s1800_s1 + $0x48] ss:$0 sps:$4 sm:$0xff]   ;;  %v1540_v16 = vld [vmem:[%s1660_s26 + $0x14] ss:$8 sps:$4 sm:$0xff]  }
  0x10   : > { %1300 = vmatprep.mubr.msk.bf16.mxu0 %vm588_vm0, %v1536_v5  ;;  %v1539_v6 = vld [vmem:[%s1660_s26 + $0x84] ss:$8 sps:$4 sm:$0xff]   ;;  %v639_v12 = vsel %vm637_vm1, %v1532_v11, 0  ;;  %v1534_v14 = vld [vmem:[%s1660_s26] ss:$8 sps:$4 sm:$0xff]  }
  0x11   : > { %1308 = vmatprep.mubr.msk.bf16.mxu1 %vm588_vm0, %v1539_v6  ;;  %v1533_v13 = vld [vmem:[%s1800_s1 + $0x40] sm:$0xff]   ;;  %v1542_v17 = vld [vmem:[%s1660_s26 + $0x94] ss:$8 sps:$4 sm:$0xff]   ;;  %v1544_v18 = vld [vmem:[%s1660_s26 + $0x10] ss:$8 sps:$4 sm:$0xff]  }
  0x12   : > { %644 = vmatpush1.bf16.msra.mxu0 %v1525_v2  ;;  %1490 = vmatpush1.bf16.msra.mxu1 %v1525_v2  ;;  %v1537_v15 = vld [vmem:[%s1660_s26 + $0x80] ss:$8 sps:$4 sm:$0xff]   ;;  %v1545_v19 = vld [vmem:[%s1660_s26 + $0x90] ss:$8 sps:$4 sm:$0xff]   ;;  %v1546_v20 = vld [vmem:[%s1660_s26 + $0x24] ss:$8 sps:$4 sm:$0xff]  }
  0x13   : > { %645 = vmatprep.subr.bf16.mxu0 %v1606_v1  ;;  %1481 = vmatprep.subr.bf16.mxu1 %v1606_v1  ;;  %v1548_v21 = vld [vmem:[%s1660_s26 + $0xa4] ss:$8 sps:$4 sm:$0xff]   ;;  %v1550_v22 = vld [vmem:[%s1660_s26 + $0x20] ss:$8 sps:$4 sm:$0xff]   ;;  %v1552_v24 = vld [vmem:[%s1660_s26 + $0x34] ss:$8 sps:$4 sm:$0xff]  }
  0x14   : > { %v1551_v23 = vld [vmem:[%s1660_s26 + $0xa0] ss:$8 sps:$4 sm:$0xff]   ;;  %v1554_v25 = vld [vmem:[%s1660_s26 + $0xb4] ss:$8 sps:$4 sm:$0xff]   ;;  %v1556_v26 = vld [vmem:[%s1660_s26 + $0x30] ss:$8 sps:$4 sm:$0xff]  }
  0x15   : > { %v1557_v27 = vld [vmem:[%s1660_s26 + $0xb0] ss:$8 sps:$4 sm:$0xff]   ;;  %v1558_v28 = vld [vmem:[%s1660_s26 + $0x44] ss:$8 sps:$4 sm:$0xff]   ;;  %v1562_v30 = vld [vmem:[%s1660_s26 + $0x40] ss:$8 sps:$4 sm:$0xff]  }
  0x16   : > { %646 = vmatpush1.bf16.msra.mxu0 %v1526_v3  ;;  %1491 = vmatpush1.bf16.msra.mxu1 %v1526_v3  ;;  %v1560_v29 = vld [vmem:[%s1660_s26 + $0xc4] ss:$8 sps:$4 sm:$0xff]   ;;  %v1563_v31 = vld [vmem:[%s1660_s26 + $0xc0] ss:$8 sps:$4 sm:$0xff]   ;;  %v1564_v32 = vld [vmem:[%s1660_s26 + $0x54] ss:$8 sps:$4 sm:$0xff]  }
  0x17   : > { %647 = vmatprep.subr.bf16.mxu0 %v1606_v1  ;;  %1482 = vmatprep.subr.bf16.mxu1 %v1606_v1  ;;  %v1566_v33 = vld [vmem:[%s1660_s26 + $0xd4] ss:$8 sps:$4 sm:$0xff]   ;;  %v1568_v34 = vld [vmem:[%s1660_s26 + $0x50] ss:$8 sps:$4 sm:$0xff]   ;;  %v1570_v36 = vld [vmem:[%s1660_s26 + $0x64] ss:$8 sps:$4 sm:$0xff]  }
  0x18   : > { %v1569_v35 = vld [vmem:[%s1660_s26 + $0xd0] ss:$8 sps:$4 sm:$0xff]   ;;  %v1572_v37 = vld [vmem:[%s1660_s26 + $0xe4] ss:$8 sps:$4 sm:$0xff]   ;;  %v1574_v38 = vld [vmem:[%s1660_s26 + $0x60] ss:$8 sps:$4 sm:$0xff]  }
  0x19   : > { %v1575_v39 = vld [vmem:[%s1660_s26 + $0xe0] ss:$8 sps:$4 sm:$0xff]   ;;  %v1576_v40 = vld [vmem:[%s1660_s26 + $0x74] ss:$8 sps:$4 sm:$0xff]   ;;  %v1580_v42 = vld [vmem:[%s1660_s26 + $0x70] ss:$8 sps:$4 sm:$0xff]  }
  0x1a   : > { %648 = vmatpush1.bf16.msra.mxu0 %v1527_v4  ;;  %1492 = vmatpush1.bf16.msra.mxu1 %v1527_v4  ;;  %v1578_v41 = vld [vmem:[%s1660_s26 + $0xf4] ss:$8 sps:$4 sm:$0xff]   ;;  %v1581_v43 = vld [vmem:[%s1660_s26 + $0xf0] ss:$8 sps:$4 sm:$0xff]   ;;  %v1734_v45 = vld [vmem:[%s1801_s2] ss:$0 sm:$0xff] }
  0x1b   : > { %649 = vmatprep.subr.bf16.mxu0 %v1606_v1  ;;  %1483 = vmatprep.subr.bf16.mxu1 %v1606_v1 }
  0x1e   : > { %650 = vmatpush1.bf16.msra.mxu0 %v1528_v7  ;;  %1493 = vmatpush1.bf16.msra.mxu1 %v1528_v7 }
  0x1f   : > { %651 = vmatprep.subr.bf16.mxu0 %v1606_v1  ;;  %1484 = vmatprep.subr.bf16.mxu1 %v1606_v1 }
  0x22   : > { %652 = vmatpush1.bf16.msra.mxu0 %v1529_v8  ;;  %1494 = vmatpush1.bf16.msra.mxu1 %v1529_v8 }
  0x23   : > { %653 = vmatprep.subr.bf16.mxu0 %v1606_v1  ;;  %1485 = vmatprep.subr.bf16.mxu1 %v1606_v1 }
  0x26   : > { %654 = vmatpush1.bf16.msra.mxu0 %v1530_v9  ;;  %1495 = vmatpush1.bf16.msra.mxu1 %v1530_v9 }
  0x27   : > { %655 = vmatprep.subr.bf16.mxu0 %v1606_v1  ;;  %1486 = vmatprep.subr.bf16.mxu1 %v1606_v1 }
  0x2a   : > { %656 = vmatpush1.bf16.msra.mxu0 %v1531_v10  ;;  %1496 = vmatpush1.bf16.msra.mxu1 %v1531_v10 }
  0x2b   : > { %669 = vmatprep.subr.bf16.mxu0 %v1606_v1  ;;  %1487 = vmatprep.subr.bf16.mxu1 %v1606_v1 }
  0x2e   : > { %670 = vmatpush2.bf16.msra.mxu0 %v639_v12  ;;  %1497 = vmatpush2.bf16.msra.mxu1 %v639_v12 }
  0x2f   : > { %671 = vmatprep.subr.bf16.mxu0 %v1606_v1  ;;  %1488 = vmatprep.subr.bf16.mxu1 %v1606_v1 }
  0x32   : > { %672 = vmatpush2.bf16.msra.mxu0 %v1533_v13  ;;  %1498 = vmatpush2.bf16.msra.mxu1 %v1533_v13 }
  0x35   : > { %674 = vmatmul.mubr.bf16.vlgmr.msra.gmra.mxu0 %v1534_v14  ;;  %738 = vmatmul.mubr.bf16.vlgmr.msra.gmra.mxu1 %v1537_v15 }
  0x36   : > { %1301 = vmatprep.mubr.msk.bf16.mxu0 %vm588_vm0, %v1540_v16  ;;  %1309 = vmatprep.mubr.msk.bf16.mxu1 %vm588_vm0, %v1542_v17 }
  0x3d   : > { %682 = vmatmul.mubr.bf16.gmra.mxu0 %v1544_v18  ;;  %746 = vmatmul.mubr.bf16.gmra.mxu1 %v1545_v19 }
  0x3e   : > { %1302 = vmatprep.mubr.msk.bf16.mxu0 %vm588_vm0, %v1546_v20  ;;  %1310 = vmatprep.mubr.msk.bf16.mxu1 %vm588_vm0, %v1548_v21 }
  0x45   : > { %690 = vmatmul.mubr.bf16.gmra.mxu0 %v1550_v22  ;;  %754 = vmatmul.mubr.bf16.gmra.mxu1 %v1551_v23 }
  0x46   : > { %1303 = vmatprep.mubr.msk.bf16.mxu0 %vm588_vm0, %v1552_v24  ;;  %1311 = vmatprep.mubr.msk.bf16.mxu1 %vm588_vm0, %v1554_v25 }
  0x4d   : > { %698 = vmatmul.mubr.bf16.gmra.mxu0 %v1556_v26  ;;  %762 = vmatmul.mubr.bf16.gmra.mxu1 %v1557_v27 }
  0x4e   : > { %1304 = vmatprep.mubr.msk.bf16.mxu0 %vm588_vm0, %v1558_v28  ;;  %1312 = vmatprep.mubr.msk.bf16.mxu1 %vm588_vm0, %v1560_v29 }
  0x55   : > { %706 = vmatmul.mubr.bf16.gmra.mxu0 %v1562_v30  ;;  %770 = vmatmul.mubr.bf16.gmra.mxu1 %v1563_v31 }
  0x56   : > { %1305 = vmatprep.mubr.msk.bf16.mxu0 %vm588_vm0, %v1564_v32  ;;  %1313 = vmatprep.mubr.msk.bf16.mxu1 %vm588_vm0, %v1566_v33 }
  0x5d   : > { %714 = vmatmul.mubr.bf16.gmra.mxu0 %v1568_v34  ;;  %778 = vmatmul.mubr.bf16.gmra.mxu1 %v1569_v35 }
  0x5e   : > { %1306 = vmatprep.mubr.msk.bf16.mxu0 %vm588_vm0, %v1570_v36  ;;  %1314 = vmatprep.mubr.msk.bf16.mxu1 %vm588_vm0, %v1572_v37 }
  0x65   : > { %722 = vmatmul.mubr.bf16.gmra.mxu0 %v1574_v38  ;;  %786 = vmatmul.mubr.bf16.gmra.mxu1 %v1575_v39 }
  0x66   : > { %1307 = vmatprep.mubr.msk.bf16.mxu0 %vm588_vm0, %v1576_v40  ;;  %1315 = vmatprep.mubr.msk.bf16.mxu1 %vm588_vm0, %v1578_v41 }
  0x6d   : > { %730 = vmatmul.mubr.bf16.gmra.mxu0 %v1580_v42  ;;  %794 = vmatmul.mubr.bf16.gmra.mxu1 %v1581_v43 }
  0xf5   : > { %v675_v44 = vpop.f32.mrf.mxu0  ;;  %v739_v46 = vpop.f32.mrf.mxu1 }
  0xf6   : > { %v908_v49 = vadd.f32 %v1734_v45, %v675_v44  ;;  %v924_v50 = vadd.f32 %v1734_v45, %v739_v46 }
  0xf7   : > { %v677_v47 = vpop.f32.mrf.mxu0  ;;  %v741_v48 = vpop.f32.mrf.mxu1 }
  0xf8   : > { %v940_v57 = vmax.f32 %v908_v49, 0.0  ;;  %v956_v58 = vmax.f32 %v924_v50, 0.0 }
  0xf9   : > { %v678_v51 = vpop.f32.mrf.mxu0  ;;  %v742_v52 = vpop.f32.mrf.mxu1 }
  0xfa   : > { %v909_v53 = vadd.f32 %v1734_v45, %v678_v51  ;;  %v925_v54 = vadd.f32 %v1734_v45, %v742_v52 }
  0xfb   : > { %v680_v55 = vpop.f32.mrf.mxu0  ;;  %v744_v56 = vpop.f32.mrf.mxu1 }
  0xfc   : > { %v941_v59 = vmax.f32 %v909_v53, 0.0  ;;  %v957_v60 = vmax.f32 %v925_v54, 0.0 }
  0xfd   : > { %v683_v61 = vpop.f32.mrf.mxu0  ;;  %v747_v62 = vpop.f32.mrf.mxu1 }
  0xfe   : > { %v1387_v63 = vpack.c.bf16 %v941_v59, %v940_v57  ;;  %v1427_v0 = vpack.c.bf16 %v957_v60, %v956_v58  ;;  %v910_v3 = vadd.f32 %v1734_v45, %v683_v61  ;;  %v926_v4 = vadd.f32 %v1734_v45, %v747_v62 }
  0xff   : > { %v685_v1 = vpop.f32.mrf.mxu0  ;;  %v749_v2 = vpop.f32.mrf.mxu1 }
 0x100   : > { %1388 = vst [vmem:[%s1744_s23] sm:$0xff] %v1387_v63   ;;  %1471 = vst [vmem:[%s1744_s23 + $0x40] sm:$0xff] %v1427_v0   ;;  %v942_v11 = vmax.f32 %v910_v3, 0.0  ;;  %v958_v12 = vmax.f32 %v926_v4, 0.0 }
 0x101   : > { %v686_v5 = vpop.f32.mrf.mxu0  ;;  %v750_v6 = vpop.f32.mrf.mxu1 }
 0x102   : > { %v911_v7 = vadd.f32 %v1734_v45, %v686_v5  ;;  %v927_v8 = vadd.f32 %v1734_v45, %v750_v6 }
 0x103   : > { %v688_v9 = vpop.f32.mrf.mxu0  ;;  %v752_v10 = vpop.f32.mrf.mxu1 }
 0x104   : > { %v943_v13 = vmax.f32 %v911_v7, 0.0  ;;  %v959_v14 = vmax.f32 %v927_v8, 0.0 }
 0x105   : > { %v691_v15 = vpop.f32.mrf.mxu0  ;;  %v755_v16 = vpop.f32.mrf.mxu1 }
 0x106   : > { %v1392_v17 = vpack.c.bf16 %v943_v13, %v942_v11  ;;  %v1432_v18 = vpack.c.bf16 %v959_v14, %v958_v12  ;;  %v912_v21 = vadd.f32 %v1734_v45, %v691_v15  ;;  %v928_v22 = vadd.f32 %v1734_v45, %v755_v16 }
 0x107   : > { %v693_v19 = vpop.f32.mrf.mxu0  ;;  %v757_v20 = vpop.f32.mrf.mxu1 }
 0x108   : > { %1464 = vst [vmem:[%s1744_s23 + $0x8] sm:$0xff] %v1392_v17   ;;  %1472 = vst [vmem:[%s1744_s23 + $0x48] sm:$0xff] %v1432_v18   ;;  %v944_v29 = vmax.f32 %v912_v21, 0.0  ;;  %v960_v30 = vmax.f32 %v928_v22, 0.0 }
 0x109   : > { %v694_v23 = vpop.f32.mrf.mxu0  ;;  %v758_v24 = vpop.f32.mrf.mxu1 }
 0x10a   : > { %v913_v25 = vadd.f32 %v1734_v45, %v694_v23  ;;  %v929_v26 = vadd.f32 %v1734_v45, %v758_v24 }
 0x10b   : > { %v696_v27 = vpop.f32.mrf.mxu0  ;;  %v760_v28 = vpop.f32.mrf.mxu1 }
 0x10c   : > { %v945_v31 = vmax.f32 %v913_v25, 0.0  ;;  %v961_v32 = vmax.f32 %v929_v26, 0.0 }
 0x10d   : > { %v699_v33 = vpop.f32.mrf.mxu0  ;;  %v763_v34 = vpop.f32.mrf.mxu1 }
 0x10e   : > { %v1397_v35 = vpack.c.bf16 %v945_v31, %v944_v29  ;;  %v1437_v36 = vpack.c.bf16 %v961_v32, %v960_v30  ;;  %v914_v39 = vadd.f32 %v1734_v45, %v699_v33  ;;  %v930_v40 = vadd.f32 %v1734_v45, %v763_v34 }
 0x10f   : > { %v701_v37 = vpop.f32.mrf.mxu0  ;;  %v765_v38 = vpop.f32.mrf.mxu1 }
 0x110   : > { %1465 = vst [vmem:[%s1744_s23 + $0x10] sm:$0xff] %v1397_v35   ;;  %1473 = vst [vmem:[%s1744_s23 + $0x50] sm:$0xff] %v1437_v36   ;;  %v946_v48 = vmax.f32 %v914_v39, 0.0  ;;  %v962_v49 = vmax.f32 %v930_v40, 0.0 }
 0x111   : > { %v702_v41 = vpop.f32.mrf.mxu0  ;;  %v766_v42 = vpop.f32.mrf.mxu1 }
 0x112   : > { %v915_v43 = vadd.f32 %v1734_v45, %v702_v41  ;;  %v931_v44 = vadd.f32 %v1734_v45, %v766_v42 }
 0x113   : > { %v704_v46 = vpop.f32.mrf.mxu0  ;;  %v768_v47 = vpop.f32.mrf.mxu1 }
 0x114   : > { %v947_v50 = vmax.f32 %v915_v43, 0.0  ;;  %v963_v51 = vmax.f32 %v931_v44, 0.0 }
 0x115   : > { %v707_v52 = vpop.f32.mrf.mxu0  ;;  %v771_v53 = vpop.f32.mrf.mxu1 }
 0x116   : > { %v1402_v54 = vpack.c.bf16 %v947_v50, %v946_v48  ;;  %v1442_v55 = vpack.c.bf16 %v963_v51, %v962_v49  ;;  %v916_v58 = vadd.f32 %v1734_v45, %v707_v52  ;;  %v932_v59 = vadd.f32 %v1734_v45, %v771_v53 }
 0x117   : > { %v709_v56 = vpop.f32.mrf.mxu0  ;;  %v773_v57 = vpop.f32.mrf.mxu1 }
 0x118   : > { %1466 = vst [vmem:[%s1744_s23 + $0x18] sm:$0xff] %v1402_v54   ;;  %1474 = vst [vmem:[%s1744_s23 + $0x58] sm:$0xff] %v1442_v55   ;;  %v948_v2 = vmax.f32 %v916_v58, 0.0  ;;  %v964_v3 = vmax.f32 %v932_v59, 0.0 }
 0x119   : > { %v710_v60 = vpop.f32.mrf.mxu0  ;;  %v774_v61 = vpop.f32.mrf.mxu1 }
 0x11a   : > { %v917_v62 = vadd.f32 %v1734_v45, %v710_v60  ;;  %v933_v63 = vadd.f32 %v1734_v45, %v774_v61 }
 0x11b   : > { %v712_v0 = vpop.f32.mrf.mxu0  ;;  %v776_v1 = vpop.f32.mrf.mxu1 }
 0x11c   : > { %v949_v4 = vmax.f32 %v917_v62, 0.0  ;;  %v965_v5 = vmax.f32 %v933_v63, 0.0 }
 0x11d   : > { %v715_v6 = vpop.f32.mrf.mxu0  ;;  %v779_v7 = vpop.f32.mrf.mxu1 }
 0x11e   : > { %v1407_v8 = vpack.c.bf16 %v949_v4, %v948_v2  ;;  %v1447_v9 = vpack.c.bf16 %v965_v5, %v964_v3  ;;  %v918_v12 = vadd.f32 %v1734_v45, %v715_v6  ;;  %v934_v13 = vadd.f32 %v1734_v45, %v779_v7 }
 0x11f   : > { %v717_v10 = vpop.f32.mrf.mxu0  ;;  %v781_v11 = vpop.f32.mrf.mxu1 }
 0x120   : > { %1467 = vst [vmem:[%s1744_s23 + $0x20] sm:$0xff] %v1407_v8   ;;  %1475 = vst [vmem:[%s1744_s23 + $0x60] sm:$0xff] %v1447_v9   ;;  %v950_v20 = vmax.f32 %v918_v12, 0.0  ;;  %v966_v21 = vmax.f32 %v934_v13, 0.0 }
 0x121   : > { %v718_v14 = vpop.f32.mrf.mxu0  ;;  %v782_v15 = vpop.f32.mrf.mxu1 }
 0x122   : > { %v919_v16 = vadd.f32 %v1734_v45, %v718_v14  ;;  %v935_v17 = vadd.f32 %v1734_v45, %v782_v15 }
 0x123   : > { %v720_v18 = vpop.f32.mrf.mxu0  ;;  %v784_v19 = vpop.f32.mrf.mxu1 }
 0x124   : > { %v951_v22 = vmax.f32 %v919_v16, 0.0  ;;  %v967_v23 = vmax.f32 %v935_v17, 0.0 }
 0x125   : > { %v723_v24 = vpop.f32.mrf.mxu0  ;;  %v787_v25 = vpop.f32.mrf.mxu1 }
 0x126   : > { %v1412_v26 = vpack.c.bf16 %v951_v22, %v950_v20  ;;  %v1452_v27 = vpack.c.bf16 %v967_v23, %v966_v21  ;;  %v920_v30 = vadd.f32 %v1734_v45, %v723_v24  ;;  %v936_v31 = vadd.f32 %v1734_v45, %v787_v25 }
 0x127   : > { %v725_v28 = vpop.f32.mrf.mxu0  ;;  %v789_v29 = vpop.f32.mrf.mxu1 }
 0x128   : > { %1468 = vst [vmem:[%s1744_s23 + $0x28] sm:$0xff] %v1412_v26   ;;  %1476 = vst [vmem:[%s1744_s23 + $0x68] sm:$0xff] %v1452_v27   ;;  %v952_v38 = vmax.f32 %v920_v30, 0.0  ;;  %v968_v39 = vmax.f32 %v936_v31, 0.0 }
 0x129   : > { %v726_v32 = vpop.f32.mrf.mxu0  ;;  %v790_v33 = vpop.f32.mrf.mxu1 }
 0x12a   : > { %v921_v34 = vadd.f32 %v1734_v45, %v726_v32  ;;  %v937_v35 = vadd.f32 %v1734_v45, %v790_v33 }
 0x12b   : > { %v728_v36 = vpop.f32.mrf.mxu0  ;;  %v792_v37 = vpop.f32.mrf.mxu1 }
 0x12c   : > { %v953_v40 = vmax.f32 %v921_v34, 0.0  ;;  %v969_v41 = vmax.f32 %v937_v35, 0.0 }
 0x12d   : > { %v731_v42 = vpop.f32.mrf.mxu0  ;;  %v795_v43 = vpop.f32.mrf.mxu1 }
 0x12e   : > { %v1417_v44 = vpack.c.bf16 %v953_v40, %v952_v38  ;;  %v1457_v46 = vpack.c.bf16 %v969_v41, %v968_v39  ;;  %v922_v49 = vadd.f32 %v1734_v45, %v731_v42  ;;  %v938_v50 = vadd.f32 %v1734_v45, %v795_v43 }
 0x12f   : > { %v733_v47 = vpop.f32.mrf.mxu0  ;;  %v797_v48 = vpop.f32.mrf.mxu1 }
 0x130   : > { %1469 = vst [vmem:[%s1744_s23 + $0x30] sm:$0xff] %v1417_v44   ;;  %1477 = vst [vmem:[%s1744_s23 + $0x70] sm:$0xff] %v1457_v46   ;;  %v954_v57 = vmax.f32 %v922_v49, 0.0  ;;  %v970_v58 = vmax.f32 %v938_v50, 0.0 }
 0x131   : > { %v734_v51 = vpop.f32.mrf.mxu0  ;;  %v798_v52 = vpop.f32.mrf.mxu1 }
 0x132   : > { %v923_v53 = vadd.f32 %v1734_v45, %v734_v51  ;;  %v939_v54 = vadd.f32 %v1734_v45, %v798_v52 }
 0x133   : > { %v736_v55 = vpop.f32.mrf.mxu0  ;;  %v800_v56 = vpop.f32.mrf.mxu1 }
 0x134   : > { %v955_v59 = vmax.f32 %v923_v53, 0.0  ;;  %v971_v60 = vmax.f32 %v939_v54, 0.0 }
 0x136   : > { %v1422_v61 = vpack.c.bf16 %v955_v59, %v954_v57  ;;  %v1462_v62 = vpack.c.bf16 %v971_v60, %v970_v58 }
 0x138   : > { %1470 = vst [vmem:[%s1744_s23 + $0x38] sm:$0xff] %v1422_v61   ;;  %1478 = vst [vmem:[%s1744_s23 + $0x78] sm:$0xff] %v1462_v62  }
 0x139 PF: > { %s13_s14 = sadd.s32 1, %s1604_s14   ;;  %s1803_s12 = smov %s1600_s13 }
 0x13a   : > { %p10_p5 = scmp.ge.s32.totalorder %s13_s14, 6   ;;  %s1804_s13 = smov %s1806_s15 }
 0x13c   :  { %12 = sbr.rel (!%p10_p5) target bundleno = 2 (0x2), region = 76 }

</bundles_post_ra>
